<compile_context>
chip_gen: v7x
topology: tpu7x:2x2x1
jax: 0.10.0
libtpu: 0.0.40
codegen_flags: <defaults>
</compile_context>

<pallas_src>
import functools

import jax
import jax.numpy as jnp
from jax import lax
from jax.experimental import pallas as pl
from jax.experimental.pallas import tpu as pltpu


# ---------------------------------------------------------------------------
# Pure-JAX reference (torch semantics).  Also the tiny-input fast path.
# ---------------------------------------------------------------------------
def _reference(x, shift_size=1):
    c = x.shape[1] // 4
    x1, x2, x3, x4 = (x[:, i * c:(i + 1) * c] for i in range(4))
    x1 = jnp.roll(x1, shift_size, axis=2)
    x2 = jnp.roll(x2, -shift_size, axis=2)
    x3 = jnp.roll(x3, shift_size, axis=3)
    x4 = jnp.roll(x4, -shift_size, axis=3)
    return jnp.concatenate([x1, x2, x3, x4], axis=1)


# ---------------------------------------------------------------------------
# Hardware query / one-time probes.
# ---------------------------------------------------------------------------
def _vmem_capacity_bytes() -> int:
    try:
        return int(pltpu.get_tpu_info().vmem_capacity_bytes)
    except Exception:                    # conservative default = v7x per-TC VMEM
        return 64 << 20


@functools.cache
def _pltpu_roll_is_jnp_roll() -> bool:
    """One-time probe of the XLU rotate direction.

    A flipped convention (out[i] = in[i + s] instead of in[i - s]) would
    silently negate every shift, so verify once against jnp.roll on a
    canonical (8, 128) f32 tile and adapt.  Runs eagerly even under tracing.
    """
    def k(x_ref, o_ref):
        o_ref[...] = pltpu.roll(x_ref[...], 1, 1)

    with jax.ensure_compile_time_eval():
        x = lax.broadcasted_iota(jnp.float32, (8, 128), 1)
        out = pl.pallas_call(
            k, out_shape=jax.ShapeDtypeStruct((8, 128), jnp.float32))(x)
        return bool(jnp.array_equal(out, jnp.roll(x, 1, axis=1)))


# ---------------------------------------------------------------------------
# In-kernel roll helpers.
# ---------------------------------------------------------------------------
def _lane_roll(x, shift):
    """jnp/torch.roll semantics (out[i] = x[i - shift]) along the last axis.

    Lowers to the XLU rotate (vector-extended slot: effectively free under the
    DMA of a memory-bound kernel).  Sub-32-bit dtypes are widened for the
    rotate and narrowed back (bit-exact), keeping the canonical 32-bit path.
    """
    size = x.shape[-1]
    shift = shift % size
    if shift == 0:
        return x
    if not _pltpu_roll_is_jnp_roll():        # flipped rotate convention
        shift = (size - shift) % size
    if x.dtype.itemsize == 4:
        return pltpu.roll(x, shift, x.ndim - 1)
    # TODO(synk): pack pairs via pltpu.bitcast for even shifts instead of widening.
    wide = jnp.float32 if jnp.issubdtype(x.dtype, jnp.floating) else jnp.int32
    return pltpu.roll(x.astype(wide), shift, x.ndim - 1).astype(x.dtype)


def _quarter_roll_flat(x, q, sh, sw, H, W):
    """Rolled value of quarter `q` (static) for a (..., H*W)-flattened block.

    torch.roll(t, s, dim): out[i] = in[(i - s) % size].
      q=0: +sh along H -> one flat roll by sh*W (the H wrap equals the flat wrap).
      q=1: -sh along H -> flat roll by ((H - sh) % H) * W.
      q=2: +sw along W -> flat rolls by s and by s - W, selected on whether the
                          in-row column wraps (col % W < s).
      q=3: -sw along W -> same with s = (W - sw) % W.
    """
    HW = H * W
    if q == 0:
        return _lane_roll(x, sh * W)
    if q == 1:
        return _lane_roll(x, ((H - sh) % H) * W)
    s = sw if q == 2 else (W - sw) % W
    if s == 0:
        return x
    col = lax.broadcasted_iota(jnp.int32, x.shape, x.ndim - 1) % W
    main = _lane_roll(x, s)                  # columns w >= s
    wrap = _lane_roll(x, (s - W) % HW)       # columns w <  s (wrap within the row)
    return jnp.where(col < s, wrap, main)


def _roll_slice_concat(x, shift, axis):
    """Static circular roll via slice+concat (always lowers; fallback only)."""
    size = x.shape[axis]
    shift = shift % size
    if shift == 0:
        return x
    lead = size - shift
    return jnp.concatenate(
        [lax.slice_in_dim(x, lead, size, axis=axis),
         lax.slice_in_dim(x, 0, lead, axis=axis)],
        axis=axis)


# ---------------------------------------------------------------------------
# Kernels.
# ---------------------------------------------------------------------------
def _scm_flat_quarter_kernel(x_ref, o_ref, *, sh, sw, H, W):
    """Block = (1, c_tile, H*W): one lane-dense tile of exactly one quarter."""
    x = x_ref[0]                             # (c_tile, H*W)
    q = pl.program_id(0)                     # quarter index 0..3
    for i in range(4):
        @pl.when(q == i)
        def _(i=i):
            o_ref[0] = _quarter_roll_flat(x, i, sh, sw, H, W)


def _scm_flat_fullc_kernel(x_ref, o_ref, *, sh, sw, H, W, cq):
    """Block = (1, C, H*W): all four quarters; rows routed to their roll.

    Used when a single quarter is too thin to tile on sublanes (e.g. C = 4).
    All variants are cheap XLU/VPU work fully hidden under the DMA.
    """
    x = x_ref[0]                             # (C, H*W)
    row_q = lax.broadcasted_iota(jnp.int32, x.shape, 0) // cq
    out = _quarter_roll_flat(x, 3, sh, sw, H, W)
    for qi in (2, 1, 0):
        out = jnp.where(row_q == qi, _quarter_roll_flat(x, qi, sh, sw, H, W), out)
    o_ref[0] = out


def _scm_4d_kernel(x_ref, o_ref, *, sh, sw):
    """Compatibility block = (1, c_tile, H, W) of one quarter."""
    x = x_ref[0]                             # (c_tile, H, W)
    H, W = x.shape[1], x.shape[2]
    q = pl.program_id(0)
    plans = ((sh, 1), ((H - sh) % H, 1), (sw, 2), ((W - sw) % W, 2))
    for i, (shift, axis) in enumerate(plans):
        @pl.when(q == i)
        def _(shift=shift, axis=axis):
            o_ref[0] = _roll_slice_concat(x, shift, axis)


# ---------------------------------------------------------------------------
# Wrappers.
# ---------------------------------------------------------------------------
def _scm_flat(x, *, sh, sw, cq, max_block_bytes, vmem_cap):
    """Lane-dense path: spatial dims flattened so every store fills 128 lanes."""
    N, C, H, W = x.shape
    HW = H * W
    itemsize = x.dtype.itemsize
    xf = x.reshape(N, C, HW)                 # metadata-only reshape

    _ = _pltpu_roll_is_jnp_roll()            # warm the direction probe eagerly

    sub = max(8, 32 // itemsize)             # sublane tile: f32 8, bf16 16, int8 32
    if cq % sub == 0:
        # One grid step = one (1, c_tile, HW) tile of exactly one quarter.
        c_tile = sub
        for d in range(sub, cq + 1, sub):
            if cq % d == 0 and d * HW * itemsize <= max_block_bytes:
                c_tile = d
        # TODO(synk): tile the non-rolled spatial axis when even a `sub`-row
        # block exceeds the budget (huge feature maps) instead of oversizing.
        n_ct = cq // c_tile
        block = (1, c_tile, HW)
        block_bytes = c_tile * HW * itemsize
        grid = (4, N, n_ct)                  # quarter axis first: even 2-TC split
        dims = ("parallel", "parallel", "parallel")
        kernel = functools.partial(_scm_flat_quarter_kernel, sh=sh, sw=sw, H=H, W=W)

        def idx(qi, ni, ti):
            return (ni, qi * n_ct + ti, 0)
    else:
        # Quarter too thin to tile on sublanes (e.g. C = 4, cq = 1).
        block = (1, C, HW)
        block_bytes = C * HW * itemsize
        grid = (N,)
        dims = ("parallel",)
        kernel = functools.partial(_scm_flat_fullc_kernel,
                                   sh=sh, sw=sw, H=H, W=W, cq=cq)

        def idx(ni):
            return (ni, 0, 0)

    # in + out, double-buffered -> ~4x block; keep headroom on every chip gen.
    vmem_limit = int(min(vmem_cap * 7 // 8,
                         max(4 * block_bytes + (4 << 20), 32 << 20)))
    out = pl.pallas_call(
        kernel,
        out_shape=jax.ShapeDtypeStruct((N, C, HW), x.dtype),
        grid_spec=pltpu.PrefetchScalarGridSpec(
            num_scalar_prefetch=0,
            grid=grid,
            in_specs=[pl.BlockSpec(block, idx)],
            out_specs=pl.BlockSpec(block, idx)),
        compiler_params=pltpu.CompilerParams(
            dimension_semantics=dims,
            vmem_limit_bytes=vmem_limit),
        cost_estimate=pl.CostEstimate(flops=0, transcendentals=0,
                                      bytes_accessed=2 * x.size * itemsize),
    )(xf)
    return out.reshape(N, C, H, W)


def _scm_4d(x, *, sh, sw, cq, max_block_bytes, vmem_cap):
    """Compatibility path for H*W not a multiple of 128 (e.g. 14x14 maps)."""
    N, C, H, W = x.shape
    itemsize = x.dtype.itemsize
    plane_bytes = H * W * itemsize
    # TODO(synk): tile the non-rolled spatial axis when plane_bytes exceeds the
    # budget instead of pinning c_tile = 1 with an oversized block.
    c_tile = 1
    for d in range(1, cq + 1):
        if cq % d == 0 and d * plane_bytes <= max_block_bytes:
            c_tile = d
    n_ct = cq // c_tile
    block = (1, c_tile, H, W)
    block_bytes = c_tile * plane_bytes

    def idx(qi, ni, ti):
        return (ni, qi * n_ct + ti, 0, 0)

    # slice+concat materializes ~2 extra block-sized temporaries -> ~6x block.
    vmem_limit = int(min(vmem_cap * 7 // 8,
                         max(6 * block_bytes + (4 << 20), 32 << 20)))
    return pl.pallas_call(
        functools.partial(_scm_4d_kernel, sh=sh, sw=sw),
        out_shape=jax.ShapeDtypeStruct((N, C, H, W), x.dtype),
        grid_spec=pltpu.PrefetchScalarGridSpec(
            num_scalar_prefetch=0,
            grid=(4, N, n_ct),
            in_specs=[pl.BlockSpec(block, idx)],
            out_specs=pl.BlockSpec(block, idx)),
        compiler_params=pltpu.CompilerParams(
            dimension_semantics=("parallel", "parallel", "parallel"),
            vmem_limit_bytes=vmem_limit),
        cost_estimate=pl.CostEstimate(flops=0, transcendentals=0,
                                      bytes_accessed=2 * x.size * itemsize),
    )(x)


def shift_channel_mix(x, shift_size=1, *, max_block_bytes=None,
                      min_pallas_bytes=1 << 20, force_pallas=False):
    """NCHW Shift_channel_mix.  C must be divisible by 4."""
    N, C, H, W = x.shape
    if C % 4 != 0:
        raise ValueError("channel dim must be divisible by 4")
    itemsize = x.dtype.itemsize

    # Tiny-input guard: per-step grid overhead + launch cost dwarfs the actual
    # HBM traffic; let XLA fuse the rolls instead.
    if not force_pallas and x.size * itemsize < min_pallas_bytes:
        return _reference(x, shift_size)

    cq = C // 4
    sh = shift_size % H                      # normalize (shift == 0 / >= dim)
    sw = shift_size % W

    vmem_cap = _vmem_capacity_bytes()
    if max_block_bytes is None:
        # ~1/16 of physical VMEM per block keeps the double-buffered in+out
        # footprint inside every generation's limits (v5e/v6e 128 MiB,
        # v7x 64 MiB) while leaving enough grid steps to hide the DMA.
        max_block_bytes = max(vmem_cap // 16, 1 << 20)

    if (H * W) % 128 == 0:
        return _scm_flat(x, sh=sh, sw=sw, cq=cq,
                         max_block_bytes=max_block_bytes, vmem_cap=vmem_cap)
    return _scm_4d(x, sh=sh, sw=sw, cq=cq,
                   max_block_bytes=max_block_bytes, vmem_cap=vmem_cap)


if __name__ == "__main__":
    key = jax.random.PRNGKey(0)

    # 1) Main demo case (lane-dense full-channel kernel, H*W = 256).
    x = jax.random.normal(key, (2, 4, 16, 16), dtype=jnp.float32)
    out = jax.block_until_ready(shift_channel_mix(x, 1, force_pallas=True))
    assert out.shape == x.shape and out.dtype == x.dtype
    assert jnp.array_equal(out, _reference(x, 1)), "mismatch (flat full-C, shift=1)"

    # 2) shift == 0 is the identity through the kernel.
    out0 = jax.block_until_ready(shift_channel_mix(x, 0, force_pallas=True))
    assert jnp.array_equal(out0, x), "mismatch (shift=0)"

    # 3) Quarter-tiled lane-dense path (cq % 8 == 0), canonical (8,128) tiles,
    #    non-trivial +/- shifts along both axes (exercises pltpu.roll).
    xb = jax.random.normal(jax.random.PRNGKey(1), (2, 32, 8, 128), jnp.float32)
    outb = jax.block_until_ready(shift_channel_mix(xb, 5, force_pallas=True))
    assert jnp.array_equal(outb, _reference(xb, 5)), "mismatch (quarter-tiled f32)"

    # 4) bf16 stays on the lane-dense path (widen -> rotate -> narrow is exact).
    xc = jax.random.normal(jax.random.PRNGKey(2), (1, 64, 8, 128)).astype(jnp.bfloat16)
    outc = jax.block_until_ready(shift_channel_mix(xc, 3, force_pallas=True))
    assert jnp.array_equal(outc, _reference(xc, 3)), "mismatch (quarter-tiled bf16)"

    # 5) 4-D compatibility path (H*W not a multiple of 128).
    xd = jax.random.normal(jax.random.PRNGKey(3), (2, 8, 16, 12), jnp.float32)
    outd = jax.block_until_ready(shift_channel_mix(xd, 2, force_pallas=True))
    assert jnp.array_equal(outd, _reference(xd, 2)), "mismatch (4-D fallback)"

    # 6) Tiny-input guard (defaults): pure-JAX path, no kernel launch.
    outg = jax.block_until_ready(shift_channel_mix(x, 1))
    assert jnp.array_equal(outg, _reference(x, 1)), "mismatch (tiny-input guard)"

    print("KERNEL_OK")
</pallas_src>

<mosaic_0001>
module attributes {stable_mosaic.version = 11 : i64} {
  func.func @k(%arg0: memref<8x128xf32, #tpu.memory_space<vmem>>, %arg1: memref<8x128xf32, #tpu.memory_space<vmem>>) attributes {dimension_semantics = [], scalar_prefetch = 0 : i64, scratch_operands = 0 : i64, tpu.core_type = #tpu.core_type<tc>} {
    %c0 = arith.constant 0 : index
    %c0_0 = arith.constant 0 : index
    %0 = vector.load %arg0[%c0, %c0_0] : memref<8x128xf32, #tpu.memory_space<vmem>>, vector<8x128xf32>
    %c1_i32 = arith.constant 1 : i32
    %1 = tpu.dynamic_rotate %0 by %c1_i32 dim 1 : vector<8x128xf32>, i32 -> vector<8x128xf32>
    %c0_1 = arith.constant 0 : index
    %c0_2 = arith.constant 0 : index
    %2 = vector.load %arg1[%c0_1, %c0_2] : memref<8x128xf32, #tpu.memory_space<vmem>>, vector<8x128xf32>
    tpu.vector_store %arg1[%c0_1, %c0_2], %1 {strides = array<i32>} : memref<8x128xf32, #tpu.memory_space<vmem>>, vector<8x128xf32>,
    return
  }
}

</mosaic_0001>

<bundles_post_ra>
// kernel: tpu_custom_call.1
= control target key start
LH: loop header
LB: loop body
LE: loop exit
PB: predicated region body
PF: predicated region fallthrough
CT: control target
= control target key end

     0   :  { %6 = vsyncpa [#allocation3], 0  ;;  %s128_s0 = inlined_call_operand.hbm [shape: f32[8,128], index: 0, kind: input, shape index: {}]   ;;  %s129_s1 = inlined_call_operand.hbm [shape: f32[8,128], index: 1, kind: output, shape index: {}]  }
   0x1   :  { %7 = vsyncpa [#allocation4], 0  ;;  %s91_s6 = smov [#allocation2]   ;;  %s43_s10 = scalar_lea.hbm %s128_s0, 128 }
   0x2   :  { %s14_s7 = sshll.u32 %s91_s6, 4  ;;  %p44_p0 = scmp.ne.s32.totalorder %s128_s0, %s43_s10  ;;  %s15_s7 = int_to_ptr.vmem [resolvable:$true] %s14_s7 }
   0x3   :  { %p47_p1 = scmp.lt.u32.totalorder %s43_s10, %s128_s0 }
   0x5   :  { %p49_p2 = pnand %p47_p1, %p44_p0 }
   0x7   :  { %52 = shalt.err (!%p49_p2)
}
   0x8   :  { %s53_s15 = scalar_lea.vmem %s15_s7, 128  ;;  %p58_p4 = scmp.lt.s32.totalorder %s15_s7, %s15_s7 }
   0x9   :  { %p54_p3 = scmp.ne.s32.totalorder %s15_s7, %s53_s15  ;;  %p59_p5 = scmp.lt.s32.totalorder %s53_s15, %s53_s15 }
   0xb   :  { %p60_p6 = por %p59_p5, %p58_p4 }
   0xd   :  { %p61_p7 = pnand %p60_p6, %p54_p3 }
   0xf   :  { %64 = shalt.err (!%p61_p7)
}
  0x10   :  { %17 = dma.hbm_to_vmem [thread:$0]  %s128_s0, 128, %s15_s7, [#allocation3]  }
  0x11   :  { %87 = dma.done.wait [#allocation3], 128  }
  0x12   :  { %88 = vsyncadd [#allocation3], 4294967168  ;;  %v21_v0 = vld [vmem:[#allocation2] sm:$0xff]  ;;  %s92_s18 = smov 1   ;;  %s93_s19 = smov [#allocation5]  }
  0x13   :  { %22 = vrot.lane.b32.xlu0 %v21_v0, %s92_s18  ;;  %s31_s20 = sshll.u32 %s93_s19, 4  ;;  %s32_s20 = int_to_ptr.vmem [resolvable:$true] %s31_s20 }
  0x14   :  { %s65_s21 = scalar_lea.vmem %s32_s20, 128  ;;  %p70_p9 = scmp.lt.s32.totalorder %s32_s20, %s32_s20 }
  0x15   :  { %p66_p8 = scmp.ne.s32.totalorder %s32_s20, %s65_s21  ;;  %p71_p10 = scmp.lt.s32.totalorder %s65_s21, %s65_s21 }
  0x17   :  { %p72_p11 = por %p71_p10, %p70_p9 }
  0x19   :  { %p73_p12 = pnand %p72_p11, %p66_p8 }
  0x85   :  { %v23_v1 = vpop.permute.xlu0 %22 }
  0x86   :  { %24 = vst [vmem:[#allocation5] sm:$0xff] %v23_v1 }
  0x87   :  { %76 = shalt.err (!%p73_p12)
}
  0x88   :  { %s77_s0 = scalar_lea.hbm %s129_s1, 128 }
  0x89   :  { %p78_p13 = scmp.ne.s32.totalorder %s129_s1, %s77_s0  ;;  %p81_p0 = scmp.lt.u32.totalorder %s77_s0, %s129_s1 }
  0x8b   :  { %p83_p1 = pnand %p81_p0, %p78_p13 }
  0x8d   :  { %86 = shalt.err (!%p83_p1)
}
  0x8e   :  { %34 = dma.vmem_to_hbm [thread:$0]  %s32_s20, 128, %s129_s1, [#allocation4]  }
  0x8f   :  { %89 = dma.done.wait [#allocation4], 128  }
  0x90   :  { %90 = vsyncadd [#allocation4], 4294967168 }
  0x91   :  { %38 = vsyncpa [#allocation3], 1 }
  0x92   :  { %39 = vsyncpa [#allocation4], 1 }

</bundles_post_ra>
